<compile_context>
chip_gen: v5e
topology: v5e:2x2
jax: 0.10.0
libtpu: 0.0.40
codegen_flags: <defaults>
</compile_context>

<pallas_src>
import functools

import jax
import jax.numpy as jnp
from jax.experimental import pallas as pl
from jax.experimental.pallas import tpu as pltpu


def _conv_matmul_kernel(u_ref, w_ref, b_ref, o_ref):
    """Single-dot im2col convolution tile.

    u_ref: [1, K, TILE]  im2col patch tile (torch unfold ordering), bf16/f32
    w_ref: [O, K]        weights in the module's native layout (same ordering)
    b_ref: [O, 1]        bias, f32
    o_ref: [1, O, TILE]  lane-dense output tile (TILE % 128 == 0)
    """
    acc = jnp.dot(w_ref[...], u_ref[0],
                  preferred_element_type=jnp.float32)      # one MXU push, depth K
    o_ref[0] = (acc + b_ref[...]).astype(o_ref.dtype)


def _unfold(x, k, stride, padding):
    """Matches torch.nn.functional.unfold: [B, C*k*k, L], K ordered (c, kh, kw)."""
    B, C, H, W = x.shape
    xp = jnp.pad(x, ((0, 0), (0, 0), (padding, padding), (padding, padding)))
    Hp, Wp = H + 2 * padding, W + 2 * padding
    oh = (Hp - k) // stride + 1
    ow = (Wp - k) // stride + 1
    cols = []
    for ki in range(k):
        for kj in range(k):
            cols.append(xp[:, :,
                           ki:ki + (oh - 1) * stride + 1:stride,
                           kj:kj + (ow - 1) * stride + 1:stride])
    patches = jnp.stack(cols, axis=2)                      # [B, C, k*k, oh, ow]
    return patches.reshape(B, C * k * k, oh * ow), oh, ow


def _choose_lane_tile(l_pad, batch, k_depth, o_ch, u_esize, out_esize,
                      *, max_tile=2048, min_steps=4, vmem_budget=32 * 2**20):
    """Largest 128-multiple lane tile dividing l_pad that (a) keeps the
    double-buffered U/out tiles inside a v7x-safe VMEM budget and (b) still
    yields >= min_steps 'parallel' grid steps (>= 2 per v7x TensorCore)."""
    per_lane = 2 * k_depth * u_esize + 2 * o_ch * out_esize   # dbl-buffered bytes/lane
    cap = max(128, (vmem_budget // (2 * per_lane)) // 128 * 128)
    hi = min(l_pad, max_tile, cap)
    cands = [t for t in range(128, hi + 1, 128) if l_pad % t == 0] or [128]
    for t in sorted(cands, reverse=True):
        if batch * (l_pad // t) >= min_steps:
            return t
    return cands[0]          # fall back to 128: maximize step count for megacore


@functools.partial(jax.jit,
                   static_argnames=("k", "stride", "padding", "compute_dtype"))
def diy_convolution(x, weights, bias, *, k, stride=1, padding=1,
                    compute_dtype=jnp.bfloat16):
    """x: [B, C, H, W]; weights: [O, C*k*k]; bias: [O] -> [B, O, OH, OW]."""
    B, C, H, W = x.shape
    O = weights.shape[0]
    K = C * k * k
    out_dtype = x.dtype

    # Wrapper-side im2col (exactly what the reference module does); XLA fuses the
    # pad / slice / stack / cast into one producer fusion for U.
    u, oh, ow = _unfold(x, k, stride, padding)              # [B, K, L]
    L = oh * ow
    L_pad = pl.cdiv(L, 128) * 128
    if L_pad != L:                                          # keep lanes 128-dense
        u = jnp.pad(u, ((0, 0), (0, 0), (0, L_pad - L)))
    w = weights
    if compute_dtype is not None and u.dtype != compute_dtype:
        u = u.astype(compute_dtype)                         # bf16 operands by default
        w = w.astype(compute_dtype)
    bias2 = bias.astype(jnp.float32).reshape(O, 1)          # f32 epilogue

    u_esize = u.dtype.itemsize
    out_esize = jnp.dtype(out_dtype).itemsize
    tile = _choose_lane_tile(L_pad, B, K, O, u_esize, out_esize)
    nt = L_pad // tile

    # Derive the VMEM cap from the actual working set (dbl-buffered U + out tiles,
    # resident W and bias) with headroom; cap below physical VMEM on every gen.
    tile_bytes = (2 * K * tile * u_esize + 2 * O * tile * out_esize
                  + O * K * u_esize + O * 4)
    vmem_limit = int(min(96 * 2**20, max(32 * 2**20, 3 * tile_bytes)))

    out = pl.pallas_call(
        _conv_matmul_kernel,
        out_shape=jax.ShapeDtypeStruct((B, O, L_pad), out_dtype),
        grid_spec=pltpu.PrefetchScalarGridSpec(
            num_scalar_prefetch=0,
            grid=(B, nt),
            in_specs=[
                pl.BlockSpec((1, K, tile), lambda b, t: (b, 0, t)),
                pl.BlockSpec((O, K), lambda b, t: (0, 0)),
                pl.BlockSpec((O, 1), lambda b, t: (0, 0)),
            ],
            out_specs=pl.BlockSpec((1, O, tile), lambda b, t: (b, 0, t)),
        ),
        compiler_params=pltpu.CompilerParams(
            dimension_semantics=("parallel", "parallel"),
            vmem_limit_bytes=vmem_limit),
    )(u, w, bias2)

    if L_pad != L:                       # minor-dim trim only in the ragged case
        out = out[:, :, :L]
    return out.reshape(B, O, oh, ow)


if __name__ == "__main__":
    # Module config (matches DiyConvolution(__init__) shapes)
    in_channels, out_channels, kernel_size = 4, 8, 3
    B, H, W = 2, 16, 16

    key = jax.random.PRNGKey(0)
    kx, kwt, kb = jax.random.split(key, 3)
    x = jax.random.normal(kx, (B, in_channels, H, W), dtype=jnp.float32)
    weights = jax.random.normal(
        kwt, (out_channels, in_channels * kernel_size * kernel_size),
        dtype=jnp.float32)
    bias = jax.random.normal(kb, (out_channels,), dtype=jnp.float32)

    def conv_reference_f32(x, weights, bias, k, stride, padding):
        w4 = weights.reshape(out_channels, in_channels, k, k)
        y = jax.lax.conv_general_dilated(
            x, w4, window_strides=(stride, stride),
            padding=[(padding, padding), (padding, padding)],
            dimension_numbers=("NCHW", "OIHW", "NCHW"),
            precision=jax.lax.Precision.HIGHEST)
        return y + bias.reshape(1, -1, 1, 1)

    for stride in (1, 2):                # stride=1 is the module default
        out = jax.block_until_ready(
            diy_convolution(x, weights, bias, k=kernel_size, stride=stride,
                            padding=1))
        u, oh, ow = _unfold(x, kernel_size, stride, 1)
        assert out.shape == (B, out_channels, oh, ow)

        # (a) Tight check against an einsum over the SAME bf16 operands
        #     (validates the Pallas matmul / BlockSpec / bias plumbing).
        ref_same = (jnp.einsum("ok,bkl->bol",
                               weights.astype(jnp.bfloat16),
                               u.astype(jnp.bfloat16),
                               preferred_element_type=jnp.float32)
                    .reshape(B, out_channels, oh, ow)
                    + bias.reshape(1, -1, 1, 1))
        assert jnp.allclose(out, ref_same, atol=1e-2, rtol=1e-2), stride

        # (b) Independent f32 convolution reference (validates unfold / conv
        #     semantics); slack covers only the bf16 operand quantization.
        ref_f32 = conv_reference_f32(x, weights, bias, kernel_size, stride, 1)
        assert jnp.allclose(out, ref_f32, atol=0.25, rtol=0.05), stride

    print("KERNEL_OK")
</pallas_src>

<mosaic_0001>
module attributes {stable_mosaic.version = 11 : i64} {
  func.func @_conv_matmul_kernel(%arg0: i32, %arg1: i32, %arg2: memref<1x36x128xbf16, #tpu.memory_space<vmem>>, %arg3: memref<8x36xbf16, #tpu.memory_space<vmem>>, %arg4: memref<8x1xf32, #tpu.memory_space<vmem>>, %arg5: memref<1x8x128xf32, #tpu.memory_space<vmem>>) attributes {dimension_semantics = [#tpu.dimension_semantics<parallel>, #tpu.dimension_semantics<parallel>], iteration_bounds = array<i64: 2, 2>, scalar_prefetch = 0 : i64, scratch_operands = 0 : i64, tpu.core_type = #tpu.core_type<tc>, window_params = [{transform_indices = @transform_0, window_bounds = array<i64: 1, 36, 128>}, {pipeline_mode = #tpu.pipeline_mode<synchronous>, transform_indices = @transform_1, window_bounds = array<i64: 8, 36>}, {pipeline_mode = #tpu.pipeline_mode<synchronous>, transform_indices = @transform_2, window_bounds = array<i64: 8, 1>}, {transform_indices = @transform_3, window_bounds = array<i64: 1, 8, 128>}]} {
    %c0 = arith.constant 0 : index
    %c0_0 = arith.constant 0 : index
    %0 = vector.load %arg3[%c0, %c0_0] : memref<8x36xbf16, #tpu.memory_space<vmem>>, vector<8x36xbf16>
    %c0_1 = arith.constant 0 : index
    %c0_2 = arith.constant 0 : index
    %c0_3 = arith.constant 0 : index
    %1 = vector.load %arg2[%c0_1, %c0_2, %c0_3] : memref<1x36x128xbf16, #tpu.memory_space<vmem>>, vector<1x36x128xbf16>
    %2 = vector.shape_cast %1 : vector<1x36x128xbf16> to vector<36x128xbf16>
    %cst = arith.constant dense<0.000000e+00> : vector<8x128xf32>
    %3 = tpu.matmul %0, %2, %cst {dimension_numbers = #tpu.dot_dimension_numbers<[1], [0], [0], [1], [0, 0, 1, 1], [], []>} : vector<8x36xbf16>, vector<36x128xbf16>, vector<8x128xf32> -> vector<8x128xf32>
    %c0_4 = arith.constant 0 : index
    %c0_5 = arith.constant 0 : index
    %4 = vector.load %arg4[%c0_4, %c0_5] : memref<8x1xf32, #tpu.memory_space<vmem>>, vector<8x1xf32>
    %5 = vector.broadcast %4 : vector<8x1xf32> to vector<8x128xf32>
    %6 = arith.addf %3, %5 : vector<8x128xf32>
    %c0_6 = arith.constant 0 : index
    %c0_7 = arith.constant 0 : index
    %c0_8 = arith.constant 0 : index
    %7 = vector.load %arg5[%c0_6, %c0_7, %c0_8] : memref<1x8x128xf32, #tpu.memory_space<vmem>>, vector<1x8x128xf32>
    %8 = vector.shape_cast %7 : vector<1x8x128xf32> to vector<8x128xf32>
    %9 = vector.shape_cast %6 : vector<8x128xf32> to vector<1x8x128xf32>
    tpu.vector_store %arg5[%c0_6, %c0_7, %c0_8], %9 {strides = array<i32>} : memref<1x8x128xf32, #tpu.memory_space<vmem>>, vector<1x8x128xf32>,
    return
  }
  func.func @transform_0(%arg0: i32, %arg1: i32) -> (i32, i32, i32) {
    %c0_i32 = arith.constant 0 : i32
    %c0_i32_0 = arith.constant 0 : i32
    return %arg0, %c0_i32, %arg1 : i32, i32, i32
  }
  func.func @transform_1(%arg0: i32, %arg1: i32) -> (i32, i32) {
    %c0_i32 = arith.constant 0 : i32
    %c0_i32_0 = arith.constant 0 : i32
    %c0_i32_1 = arith.constant 0 : i32
    return %c0_i32, %c0_i32_0 : i32, i32
  }
  func.func @transform_2(%arg0: i32, %arg1: i32) -> (i32, i32) {
    %c0_i32 = arith.constant 0 : i32
    %c0_i32_0 = arith.constant 0 : i32
    %c0_i32_1 = arith.constant 0 : i32
    return %c0_i32, %c0_i32_0 : i32, i32
  }
  func.func @transform_3(%arg0: i32, %arg1: i32) -> (i32, i32, i32) {
    %c0_i32 = arith.constant 0 : i32
    %c0_i32_0 = arith.constant 0 : i32
    return %arg0, %c0_i32, %arg1 : i32, i32, i32
  }
}

</mosaic_0001>

<bundles_post_ra>
// kernel: diy_convolution.1
= control target key start
LH: loop header
LB: loop body
LE: loop exit
PB: predicated region body
PF: predicated region fallthrough
CT: control target
= control target key end

     0   :  { %s551_s12 = smov 0   ;;  %s553_s13 = smov 0   ;;  %s648_s0 = inlined_call_operand.vmem [shape: bf16[2,36,256], index: 0, kind: input, shape index: {}]   ;;  %s649_s1 = inlined_call_operand.vmem [shape: bf16[8,36], index: 1, kind: input, shape index: {}]   ;;  %s650_s2 = inlined_call_operand.vmem [shape: f32[8,1], index: 2, kind: input, shape index: {}]   ;;  %s651_s3 = inlined_call_operand.vmem [shape: f32[2,8,256], index: 3, kind: output, shape index: {}]  }
   0x1   :  { %s555_s14 = smov 0   ;;  %s557_s15 = smov 0  }
   0x2   :  { %s559_s16 = smov 0   ;;  %s561_s17 = smov 0  }
   0x3   :  { %s563_s18 = smov 0  }
   0x4 LB: > { %s22_s19 = sadd.s32 1, %s520_s16  ;;  %s25_s20 = sadd.s32 1, %s524_s17  ;;  %s528_s18 = sphi %s563_s18, %s13_s18   ;;  %s524_s17 = sphi %s561_s17, %s657_s17   ;;  %s520_s16 = sphi %s559_s16, %s656_s16   ;;  %s516_s15 = sphi %s557_s15, %s655_s15   ;;  %s512_s14 = sphi %s555_s14, %s654_s14   ;;  %s508_s13 = sphi %s553_s13, %s653_s13   ;;  %s504_s12 = sphi %s551_s12, %s652_s12  }
   0x5   : > { %p23_p0 = scmp.ge.s32.totalorder %s22_s19, 2  ;;  %p41_p1 = scmp.ne.s32.totalorder %s508_s13, %s504_s12 }
   0x6   : > { %p42_p2 = scmp.eq.s32.totalorder %s528_s18, 0  ;;  %s34_s24 = sadd.s32 1, %s508_s13 }
   0x7   : > { %s659_s19 = smov (%p23_p0, %s22_s19), 0  ;;  %s661_s20 = smov (!%p23_p0, %s25_s20), %s524_s17 }
   0x8   : > { %p43_p3 = por %p42_p2, %p41_p1  ;;  %p27_p4 = scmp.ge.s32.totalorder %s661_s20, 2 }
   0x9   : > { %s30_s21 = ssub.s32 %s520_s16, %s659_s19  ;;  %p395_p6 = scmp.ge.s32.totalorder %s528_s18, 4 }
   0xa   : > { %s663_s20 = smov (%p27_p4, %s661_s20), 0 }
   0xb   : > { %s29_s22 = ssub.s32 %s524_s17, %s663_s20  ;;  %143 = sbr.rel (%p395_p6) target bundleno = 28 (0x1c), region = 24 }
   0xc   : > { %s31_s23 = sor.u32 %s30_s21, %s29_s22 }
   0xd   : > { %p32_p5 = scmp.eq.s32.totalorder %s31_s23, 0 }
   0xf   : > { %s602_s25 = scalar_select %p32_p5, %s508_s13, %s34_s24  }
  0x10   : > { %146 = sbr.rel (!%p43_p3) target bundleno = 28 (0x1c), region = 28  ;;  %s148_s26 = sand.u32 (%p43_p3), 1, %s508_s13  }
  0x11   : > { %s414_s27 = smul.u32 (%p43_p3), 10, %s524_s17 }
  0x12   : > { %s413_s28 = smul.u32 (%p43_p3), 20, %s148_s26 }
  0x13   : > { %s152_s29 = sadd.s32 (%p43_p3), %s520_s16, %s414_s27 }
  0x14   : > { %s396_s30 = sshll.u32 (%p43_p3), %s152_s29, 2  ;;  %s150_s7 = scalar_lea.vmem (%p43_p3), [#allocation2], %s413_s28 }
  0x15   : > { %s154_s6 = scalar_lea.vmem %s648_s0, %s396_s30 }
  0x16   : > { %v171_v0 = vld [vmem:[%s154_s6] sm:$0xf]  ;;  %v173_v1 = vld [vmem:[%s154_s6 + $0x8] sm:$0xf]  ;;  %v175_v2 = vld [vmem:[%s154_s6 + $0x10] sm:$0xf] }
  0x17   : > { %172 = vst [vmem:[%s150_s7] sm:$0xf] %v171_v0  ;;  %v177_v3 = vld [vmem:[%s154_s6 + $0x18] sm:$0xf]  ;;  %v179_v4 = vld [vmem:[%s154_s6 + $0x20] sm:$0xf] }
  0x18   : > { %174 = vst [vmem:[%s150_s7 + $0x4] sm:$0xf] %v173_v1 }
  0x19   : > { %176 = vst [vmem:[%s150_s7 + $0x8] sm:$0xf] %v175_v2 }
  0x1a   : > { %178 = vst [vmem:[%s150_s7 + $0xc] sm:$0xf] %v177_v3 }
  0x1b   : > { %180 = vst [vmem:[%s150_s7 + $0x10] sm:$0xf] %v179_v4 }
  0x1c PF: > { %p397_p7 = scmp.ge.s32.totalorder %s528_s18, 1  ;;  %p213_p8 = scmp.lt.s32.totalorder %s528_s18, 5 }
  0x1e   : > { %p214_p9 = pnand %p397_p7, %p213_p8 }
  0x1f   : > { %s220_s8 = sand.u32 (!%p214_p9), 1, %s504_s12   ;;  %p246_p10 = scmp.lt.s32.totalorder (!%p214_p9), %s516_s15, 1 }
  0x20   : > { %217 = sbr.rel (%p214_p9) target bundleno = 189 (0xbd), region = 69  ;;  %p248_p11 = scmp.lt.s32.totalorder (!%p214_p9), %s512_s14, 1 }
  0x21   : > { %s415_s9 = smul.u32 (!%p214_p9), 20, %s220_s8 }
  0x23   : > { %s222_s21 = scalar_lea.vmem (!%p214_p9), [#allocation2], %s415_s9 }
  0x25   : > { %v530_v5 = vmov 0   ;;  %v261_v6 = vld [vmem:[%s650_s2] sm:$0xff]  ;;  %vm286_vm0 = vcmask 1041408   ;;  %vm282_vm1 = vcmask 293888   ;;  %s665_s15 = smov (!%p246_p10, %s516_s15), 1  ;;  %s667_s14 = smov (!%p248_p11, %s512_s14), 1 }
  0x26   : > { %473 = vset.pattern.permute.xlu0 %v530_v5  ;;  %v260_v7 = vld [vmem:[%s222_s21 + $0x10] sm:$0x3]  ;;  %v412_v11 = vld [vmem:[%s222_s21 + $0x8] sm:$0xff]  ;;  %v411_v12 = vld [vmem:[%s222_s21] sm:$0xff]  ;;  %s398_s23 = sshll.u32 %s665_s15, 1 }
  0x27   : > { %264 = vperm.xlu0 %473, %v261_v6   ;;  %v276_v8 = vunpack.c.l.b16 %v260_v7  ;;  %v255_v13 = vld [vmem:[%s649_s1] sm:$0xf]  ;;  %s251_s24 = sadd.s32 %s398_s23, %s667_s14 }
  0x28   : > { %s399_s26 = sshll.u32 %s251_s24, 3 }
  0x29   : > { %v279_v9 = vpack.c.b16 %v276_v8, %v276_v8  ;;  %s253_s29 = scalar_lea.vmem %s651_s3, %s399_s26 }
  0x2b   : > { %v288_v10 = vsel %vm286_vm0, %v279_v9, 0 }
  0x2c   : > { %295 = vmatpush.bf16.msra.mxu0 %v288_v10 }
  0x30   : > { %296 = vmatpush.bf16.msra.mxu0 %v412_v11 }
  0x34   : > { %297 = vmatpush.bf16.msra.mxu0 %v411_v12 }
  0x37   : > { %408 = vmatmul.msk.bf16.vlgmr.msra.gmra.mxu0 %vm282_vm1, %v255_v13 }
  0x99   : > { %v265_v14 = vpop.permute.xlu0 %264 }
  0xb4   : > { %v299_v15 = vpop.f32.mrf.mxu0 }
  0xb5   : > { %v300_v16 = vadd.f32 %v299_v15, %v265_v14 }
  0xb7   : > { %303 = vst [vmem:[%s253_s29] sm:$0xff] %v300_v16 }
  0xbc   : > { %v301_v17 = vpop.f32.mrf.mxu0 }
  0xbd PF: > { %s13_s18 = sadd.s32 1, %s528_s18   ;;  %s652_s12 = smov %s508_s13 }
  0xbe   : > { %p10_p12 = scmp.ge.s32.totalorder %s13_s18, 6   ;;  %s653_s13 = smov %s602_s25 }
  0xbf   : > { %s654_s14 = smov %s520_s16  ;;  %s655_s15 = smov %s524_s17 }
  0xc0   : > { %s656_s16 = smov %s659_s19  ;;  %s657_s17 = smov %s663_s20 }
  0xc1   :  { %12 = sbr.rel (!%p10_p12) target bundleno = 4 (0x4), region = 108 }

</bundles_post_ra>
